<compile_context>
chip_gen: v7x
topology: tpu7x:2x2x1
jax: 0.10.0
libtpu: 0.0.40
codegen_flags: <defaults>
</compile_context>

<pallas_src>
import functools

import jax
import jax.numpy as jnp
from jax.experimental import pallas as pl
from jax.experimental.pallas import tpu as pltpu

LANE = 128
HIDDEN = 64


def _round_up(n, m):
    return ((n + m - 1) // m) * m


def dqn_kernel(x_ref, w_ref, b_ref, o_ref, *, p):
    # x_ref: (tb, P) bf16   w_ref: (3P, P) bf16   b_ref: (8, P) f32
    x = x_ref[...]

    # Layer 1: (tb, P) @ (P, P) + b1 -> ReLU   (f32 accumulation on the MXU)
    h1 = jnp.dot(x, w_ref[0:p, :], preferred_element_type=jnp.float32)
    h1 = jnp.maximum(h1 + b_ref[0:1, :], 0.0)

    # Layer 2
    h2 = jnp.dot(h1.astype(jnp.bfloat16), w_ref[p:2 * p, :],
                 preferred_element_type=jnp.float32)
    h2 = jnp.maximum(h2 + b_ref[1:2, :], 0.0)

    # Layer 3 (no activation)
    out = jnp.dot(h2.astype(jnp.bfloat16), w_ref[2 * p:3 * p, :],
                  preferred_element_type=jnp.float32)
    o_ref[...] = (out + b_ref[2:3, :]).astype(o_ref.dtype)


def pack_dqn_params(params):
    """One-time packing: pad every layer to (P, P) bf16 and concatenate.

    Zero padding is exact: padded hidden columns stay 0 through ReLU, padded
    weight rows are 0, so the math is identical to the unpadded network.
    """
    state = params["w1"].shape[0]
    hidden = params["w2"].shape[0]
    action = params["w3"].shape[1]
    P = _round_up(max(state, hidden, action), LANE)

    def pad_w(w):
        return (jnp.zeros((P, P), jnp.bfloat16)
                .at[: w.shape[0], : w.shape[1]]
                .set(w.astype(jnp.bfloat16)))

    w_slab = jnp.concatenate(
        [pad_w(params["w1"]), pad_w(params["w2"]), pad_w(params["w3"])], axis=0)

    b_slab = jnp.zeros((8, P), jnp.float32)
    b_slab = b_slab.at[0, :hidden].set(params["b1"].reshape(-1))
    b_slab = b_slab.at[1, :hidden].set(params["b2"].reshape(-1))
    b_slab = b_slab.at[2, :action].set(params["b3"].reshape(-1))

    return {"w": w_slab, "b": b_slab, "p": P, "state": state, "action": action}


def dqn_forward(x, packed):
    """x: (batch, state_size) f32; packed: output of pack_dqn_params."""
    P = packed["p"]
    S = packed["state"]
    A = packed["action"]
    B = x.shape[0]

    # Batch tiling: stream 256-row tiles for replay-sized batches; otherwise a
    # single sublane-aligned tile.  Weights stay resident across grid steps.
    tb = 256 if B >= 256 else _round_up(max(B, 8), 8)
    Bp = _round_up(B, tb)

    xp = (jnp.zeros((Bp, P), jnp.bfloat16)
          .at[:B, :S].set(x.astype(jnp.bfloat16)))

    kernel = functools.partial(dqn_kernel, p=P)

    out = pl.pallas_call(
        kernel,
        out_shape=jax.ShapeDtypeStruct((Bp, P), jnp.float32),
        grid=(Bp // tb,),
        in_specs=[
            pl.BlockSpec((tb, P), lambda i: (i, 0)),        # activations: streamed
            pl.BlockSpec((3 * P, P), lambda i: (0, 0)),     # packed weights: resident
            pl.BlockSpec((8, P), lambda i: (0, 0)),         # packed biases: resident
        ],
        out_specs=pl.BlockSpec((tb, P), lambda i: (i, 0)),
        compiler_params=pltpu.CompilerParams(
            dimension_semantics=("parallel",)),
    )(xp, packed["w"], packed["b"])

    return out[:B, :A]


def init_dqn_params(key, state_size, action_size, hidden=HIDDEN):
    """Deterministic PyTorch-style init: U(-1/sqrt(fan_in), 1/sqrt(fan_in))."""
    def linear(k, fan_in, fan_out):
        kw, kb = jax.random.split(k)
        bound = 1.0 / jnp.sqrt(float(fan_in))
        w = jax.random.uniform(kw, (fan_in, fan_out), jnp.float32, -bound, bound)
        b = jax.random.uniform(kb, (1, fan_out), jnp.float32, -bound, bound)
        return w, b

    k1, k2, k3 = jax.random.split(key, 3)
    w1, b1 = linear(k1, state_size, hidden)
    w2, b2 = linear(k2, hidden, hidden)
    w3, b3 = linear(k3, hidden, action_size)
    return {"w1": w1, "b1": b1, "w2": w2, "b2": b2, "w3": w3, "b3": b3}


def dqn_reference_f32(x, p):
    h1 = jnp.maximum(x @ p["w1"] + p["b1"], 0.0)
    h2 = jnp.maximum(h1 @ p["w2"] + p["b2"], 0.0)
    return h2 @ p["w3"] + p["b3"]


def dqn_reference_bf16(x, p):
    """Same bf16-operand / f32-accumulate math as the kernel."""
    xb = x.astype(jnp.bfloat16)
    h1 = jnp.maximum(
        jnp.dot(xb, p["w1"].astype(jnp.bfloat16),
                preferred_element_type=jnp.float32) + p["b1"], 0.0)
    h2 = jnp.maximum(
        jnp.dot(h1.astype(jnp.bfloat16), p["w2"].astype(jnp.bfloat16),
                preferred_element_type=jnp.float32) + p["b2"], 0.0)
    return jnp.dot(h2.astype(jnp.bfloat16), p["w3"].astype(jnp.bfloat16),
                   preferred_element_type=jnp.float32) + p["b3"]


if __name__ == "__main__":
    key = jax.random.PRNGKey(0)
    k_params, k_x = jax.random.split(key)

    batch = 8
    state_size = 16
    action_size = 8

    params = init_dqn_params(k_params, state_size, action_size)
    packed = pack_dqn_params(params)          # one-time packing (outside hot loop)
    x = jax.random.normal(k_x, (batch, state_size), jnp.float32)

    out = dqn_forward(x, packed)
    out = jax.block_until_ready(out)

    assert out.shape == (batch, action_size), out.shape

    # Tight check against the bf16-operand reference (same math as the kernel).
    ref_bf16 = dqn_reference_bf16(x, params)
    assert jnp.allclose(out, ref_bf16, atol=5e-3, rtol=5e-3), "mismatch vs bf16 reference"

    # Sanity check against the full-f32 reference (bf16 operand rounding only).
    ref_f32 = dqn_reference_f32(x, params)
    assert jnp.allclose(out, ref_f32, atol=5e-2, rtol=5e-2), "mismatch vs f32 reference"

    print("KERNEL_OK")
</pallas_src>

<mosaic_0001>
module attributes {stable_mosaic.version = 11 : i64} {
  func.func @dqn_kernel(%arg0: i32, %arg1: memref<8x128xbf16, #tpu.memory_space<vmem>>, %arg2: memref<384x128xbf16, #tpu.memory_space<vmem>>, %arg3: memref<8x128xf32, #tpu.memory_space<vmem>>, %arg4: memref<8x128xf32, #tpu.memory_space<vmem>>) attributes {dimension_semantics = [#tpu.dimension_semantics<parallel>], iteration_bounds = array<i64: 1>, scalar_prefetch = 0 : i64, scratch_operands = 0 : i64, tpu.core_type = #tpu.core_type<tc>, window_params = [{transform_indices = @transform_0, window_bounds = array<i64: 8, 128>}, {pipeline_mode = #tpu.pipeline_mode<synchronous>, transform_indices = @transform_1, window_bounds = array<i64: 384, 128>}, {pipeline_mode = #tpu.pipeline_mode<synchronous>, transform_indices = @transform_2, window_bounds = array<i64: 8, 128>}, {transform_indices = @transform_3, window_bounds = array<i64: 8, 128>}]} {
    %c0 = arith.constant 0 : index
    %c0_0 = arith.constant 0 : index
    %0 = vector.load %arg1[%c0, %c0_0] : memref<8x128xbf16, #tpu.memory_space<vmem>>, vector<8x128xbf16>
    %c0_1 = arith.constant 0 : index
    %c0_2 = arith.constant 0 : index
    %1 = vector.load %arg2[%c0_1, %c0_2] : memref<384x128xbf16, #tpu.memory_space<vmem>>, vector<128x128xbf16>
    %cst = arith.constant dense<0.000000e+00> : vector<8x128xf32>
    %2 = tpu.matmul %0, %1, %cst {dimension_numbers = #tpu.dot_dimension_numbers<[1], [0], [0], [1], [0, 0, 1, 1], [], []>} : vector<8x128xbf16>, vector<128x128xbf16>, vector<8x128xf32> -> vector<8x128xf32>
    %c0_3 = arith.constant 0 : index
    %c0_4 = arith.constant 0 : index
    %3 = vector.load %arg3[%c0_3, %c0_4] : memref<8x128xf32, #tpu.memory_space<vmem>>, vector<1x128xf32>
    %4 = vector.broadcast %3 : vector<1x128xf32> to vector<8x128xf32>
    %5 = arith.addf %2, %4 : vector<8x128xf32>
    %cst_5 = arith.constant 0.000000e+00 : f32
    %6 = vector.broadcast %cst_5 : f32 to vector<8x128xf32>
    %7 = arith.maximumf %5, %6 : vector<8x128xf32>
    %8 = arith.truncf %7 : vector<8x128xf32> to vector<8x128xbf16>
    %c128 = arith.constant 128 : index
    %c0_6 = arith.constant 0 : index
    %9 = vector.load %arg2[%c128, %c0_6] : memref<384x128xbf16, #tpu.memory_space<vmem>>, vector<128x128xbf16>
    %cst_7 = arith.constant dense<0.000000e+00> : vector<8x128xf32>
    %10 = tpu.matmul %8, %9, %cst_7 {dimension_numbers = #tpu.dot_dimension_numbers<[1], [0], [0], [1], [0, 0, 1, 1], [], []>} : vector<8x128xbf16>, vector<128x128xbf16>, vector<8x128xf32> -> vector<8x128xf32>
    %c1 = arith.constant 1 : index
    %c0_8 = arith.constant 0 : index
    %11 = vector.load %arg3[%c1, %c0_8] : memref<8x128xf32, #tpu.memory_space<vmem>>, vector<1x128xf32>
    %12 = vector.broadcast %11 : vector<1x128xf32> to vector<8x128xf32>
    %13 = arith.addf %10, %12 : vector<8x128xf32>
    %cst_9 = arith.constant 0.000000e+00 : f32
    %14 = vector.broadcast %cst_9 : f32 to vector<8x128xf32>
    %15 = arith.maximumf %13, %14 : vector<8x128xf32>
    %16 = arith.truncf %15 : vector<8x128xf32> to vector<8x128xbf16>
    %c256 = arith.constant 256 : index
    %c0_10 = arith.constant 0 : index
    %17 = vector.load %arg2[%c256, %c0_10] : memref<384x128xbf16, #tpu.memory_space<vmem>>, vector<128x128xbf16>
    %cst_11 = arith.constant dense<0.000000e+00> : vector<8x128xf32>
    %18 = tpu.matmul %16, %17, %cst_11 {dimension_numbers = #tpu.dot_dimension_numbers<[1], [0], [0], [1], [0, 0, 1, 1], [], []>} : vector<8x128xbf16>, vector<128x128xbf16>, vector<8x128xf32> -> vector<8x128xf32>
    %c2 = arith.constant 2 : index
    %c0_12 = arith.constant 0 : index
    %19 = vector.load %arg3[%c2, %c0_12] : memref<8x128xf32, #tpu.memory_space<vmem>>, vector<1x128xf32>
    %20 = vector.broadcast %19 : vector<1x128xf32> to vector<8x128xf32>
    %21 = arith.addf %18, %20 : vector<8x128xf32>
    %c0_13 = arith.constant 0 : index
    %c0_14 = arith.constant 0 : index
    %22 = vector.load %arg4[%c0_13, %c0_14] : memref<8x128xf32, #tpu.memory_space<vmem>>, vector<8x128xf32>
    tpu.vector_store %arg4[%c0_13, %c0_14], %21 {strides = array<i32>} : memref<8x128xf32, #tpu.memory_space<vmem>>, vector<8x128xf32>,
    return
  }
  func.func @transform_0(%arg0: i32) -> (i32, i32) {
    %c0_i32 = arith.constant 0 : i32
    %c0_i32_0 = arith.constant 0 : i32
    return %arg0, %c0_i32 : i32, i32
  }
  func.func @transform_1(%arg0: i32) -> (i32, i32) {
    %c0_i32 = arith.constant 0 : i32
    %c0_i32_0 = arith.constant 0 : i32
    %c0_i32_1 = arith.constant 0 : i32
    return %c0_i32, %c0_i32_0 : i32, i32
  }
  func.func @transform_2(%arg0: i32) -> (i32, i32) {
    %c0_i32 = arith.constant 0 : i32
    %c0_i32_0 = arith.constant 0 : i32
    %c0_i32_1 = arith.constant 0 : i32
    return %c0_i32, %c0_i32_0 : i32, i32
  }
  func.func @transform_3(%arg0: i32) -> (i32, i32) {
    %c0_i32 = arith.constant 0 : i32
    %c0_i32_0 = arith.constant 0 : i32
    return %arg0, %c0_i32 : i32, i32
  }
}

</mosaic_0001>

<bundles_post_ra>
// kernel: tpu_custom_call.1
= control target key start
LH: loop header
LB: loop body
LE: loop exit
PB: predicated region body
PF: predicated region fallthrough
CT: control target
= control target key end

     0   :  { %8 = vsyncpa [#allocation3], 0  ;;  %s748_s0 = inlined_call_operand.hbm [shape: bf16[8,128], index: 0, kind: input, shape index: {}]   ;;  %s749_s1 = inlined_call_operand.hbm [shape: bf16[384,128], index: 1, kind: input, shape index: {}]   ;;  %s750_s2 = inlined_call_operand.hbm [shape: f32[8,128], index: 2, kind: input, shape index: {}]   ;;  %s751_s3 = inlined_call_operand.hbm [shape: f32[8,128], index: 3, kind: output, shape index: {}]  }
   0x1   :  { %9 = vsyncpa [#allocation6], 0 }
   0x2   :  { %10 = vsyncpa [#allocation4], 0  ;;  %s642_s12 = smov [#allocation5]   ;;  %s548_s16 = scalar_lea.hbm %s749_s1, 3072 }
   0x3   :  { %s26_s13 = sshll.u32 %s642_s12, 4  ;;  %p549_p0 = scmp.ne.s32.totalorder %s749_s1, %s548_s16  ;;  %s27_s13 = int_to_ptr.vmem [resolvable:$true] %s26_s13 }
   0x4   :  { %p552_p1 = scmp.lt.u32.totalorder %s548_s16, %s749_s1 }
   0x6   :  { %p554_p2 = pnand %p552_p1, %p549_p0 }
   0x8   :  { %557 = shalt.err (!%p554_p2)
}
   0x9   :  { %s558_s21 = scalar_lea.vmem %s27_s13, 3072  ;;  %p563_p4 = scmp.lt.s32.totalorder %s27_s13, %s27_s13 }
   0xa   :  { %p559_p3 = scmp.ne.s32.totalorder %s27_s13, %s558_s21  ;;  %p564_p5 = scmp.lt.s32.totalorder %s558_s21, %s558_s21 }
   0xc   :  { %p565_p6 = por %p564_p5, %p563_p4 }
   0xe   :  { %p566_p7 = pnand %p565_p6, %p559_p3 }
  0x10   :  { %569 = shalt.err (!%p566_p7)
}
  0x11   :  { %s643_s22 = smov 64   ;;  %s644_s23 = smov 4  }
  0x12   :  { %32 = dma.hbm_to_vmem [thread:$0]  %s749_s1, 3072, %s27_s13, [#allocation6], %s643_s22, %s643_s22, %s644_s23  }
  0x13   :  { %s645_s26 = smov [#allocation2]   ;;  %s646_s28 = smov [#allocation7]  }
  0x14   :  { %s17_s27 = sshll.u32 %s645_s26, 4  ;;  %s39_s29 = sshll.u32 %s646_s28, 4  ;;  %s18_s27 = int_to_ptr.vmem [resolvable:$true] %s17_s27  ;;  %s40_s29 = int_to_ptr.vmem [resolvable:$true] %s39_s29 }
  0x15   :  { %s570_s5 = scalar_lea.hbm %s748_s0, 64 }
  0x16   :  { %p571_p8 = scmp.ne.s32.totalorder %s748_s0, %s570_s5  ;;  %p574_p9 = scmp.lt.u32.totalorder %s570_s5, %s748_s0 }
  0x18   :  { %p576_p10 = pnand %p574_p9, %p571_p8 }
  0x1a   :  { %579 = shalt.err (!%p576_p10)
}
  0x1b   :  { %s580_s1 = scalar_lea.vmem %s18_s27, 64  ;;  %p585_p12 = scmp.lt.s32.totalorder %s18_s27, %s18_s27 }
  0x1c   :  { %p581_p11 = scmp.ne.s32.totalorder %s18_s27, %s580_s1  ;;  %p586_p13 = scmp.lt.s32.totalorder %s580_s1, %s580_s1 }
  0x1e   :  { %p587_p0 = por %p586_p13, %p585_p12 }
  0x20   :  { %p588_p1 = pnand %p587_p0, %p581_p11 }
  0x22   :  { %591 = shalt.err (!%p588_p1)
}
  0x23   :  { %20 = dma.hbm_to_vmem [thread:$0]  %s748_s0, 64, %s18_s27, [#allocation3]  }
  0x24   :  { %s592_s14 = scalar_lea.hbm %s750_s2, 128 }
  0x25   :  { %p593_p2 = scmp.ne.s32.totalorder %s750_s2, %s592_s14  ;;  %p596_p3 = scmp.lt.u32.totalorder %s592_s14, %s750_s2 }
  0x27   :  { %p598_p4 = pnand %p596_p3, %p593_p2 }
  0x29   :  { %601 = shalt.err (!%p598_p4)
}
  0x2a   :  { %s602_s19 = scalar_lea.vmem %s40_s29, 128  ;;  %p607_p6 = scmp.lt.s32.totalorder %s40_s29, %s40_s29 }
  0x2b   :  { %p603_p5 = scmp.ne.s32.totalorder %s40_s29, %s602_s19  ;;  %p608_p7 = scmp.lt.s32.totalorder %s602_s19, %s602_s19 }
  0x2d   :  { %p609_p8 = por %p608_p7, %p607_p6 }
  0x2f   :  { %p610_p9 = pnand %p609_p8, %p603_p5 }
  0x31   :  { %613 = shalt.err (!%p610_p9)
}
  0x32   :  { %42 = dma.hbm_to_vmem [thread:$0]  %s750_s2, 128, %s40_s29, [#allocation6]  }
  0x33   :  { %636 = dma.done.wait [#allocation3], 64  }
  0x34   :  { %637 = vsyncadd [#allocation3], 4294967232 }
  0x35   :  { %638 = dma.done.wait [#allocation6], 3200  }
  0x36   :  { %639 = vsyncadd [#allocation6], 4294964096  ;;  %v647_v0 = vmov 0.0   ;;  %vm648_vm0 = vmmov 0   ;;  %v524_v1 = vld [vmem:[#allocation5] sm:$0xff]   ;;  %v525_v2 = vld [vmem:[#allocation5 + $0x8] sm:$0xff]  }
  0x37   :  { %456 = vmatprep.subr.bf16.mxu0 %v647_v0  ;;  %472 = vmatprep.mubr.msk.bf16.mxu0 %vm648_vm0, %v647_v0  ;;  %v526_v3 = vld [vmem:[#allocation5 + $0x10] sm:$0xff]   ;;  %v532_v4 = vld [vmem:[#allocation5 + $0x40] sm:$0xff]   ;;  %v527_v5 = vld [vmem:[#allocation5 + $0x18] sm:$0xff]   ;;  %s649_s2 = smov [#allocation8]  }
  0x38   :  { %476 = vmatprep.subr.bf16.mxu1 %v647_v0  ;;  %492 = vmatprep.mubr.msk.bf16.mxu1 %vm648_vm0, %v647_v0  ;;  %v533_v6 = vld [vmem:[#allocation5 + $0x48] sm:$0xff]   ;;  %v528_v7 = vld [vmem:[#allocation5 + $0x20] sm:$0xff]   ;;  %v534_v8 = vld [vmem:[#allocation5 + $0x50] sm:$0xff]   ;;  %s392_s21 = sshll.u32 %s649_s2, 4  ;;  %s393_s21 = int_to_ptr.vmem [resolvable:$true] %s392_s21 }
  0x39   :  { %457 = vmatpush3.bf16.msra.mxu0 %v524_v1  ;;  %477 = vmatpush3.bf16.msra.mxu1 %v532_v4  ;;  %v529_v9 = vld [vmem:[#allocation5 + $0x28] sm:$0xff]   ;;  %v535_v10 = vld [vmem:[#allocation5 + $0x58] sm:$0xff]   ;;  %v530_v11 = vld [vmem:[#allocation5 + $0x30] sm:$0xff]   ;;  %s614_s22 = scalar_lea.vmem %s393_s21, 128  ;;  %p619_p11 = scmp.lt.s32.totalorder %s393_s21, %s393_s21 }
  0x3a   :  { %458 = vmatprep.subr.bf16.mxu0 %v647_v0  ;;  %478 = vmatprep.subr.bf16.mxu1 %v647_v0  ;;  %v536_v12 = vld [vmem:[#allocation5 + $0x60] sm:$0xff]   ;;  %v531_v13 = vld [vmem:[#allocation5 + $0x38] sm:$0xff]   ;;  %v537_v14 = vld [vmem:[#allocation5 + $0x68] sm:$0xff]   ;;  %p615_p10 = scmp.ne.s32.totalorder %s393_s21, %s614_s22  ;;  %p620_p12 = scmp.lt.s32.totalorder %s614_s22, %s614_s22 }
  0x3b   :  { %v53_v15 = vld [vmem:[#allocation2] sm:$0xf]  ;;  %v538_v16 = vld [vmem:[#allocation5 + $0x70] sm:$0xff]   ;;  %v540_v18 = vld [vmem:[#allocation5 + $0x80] sm:$0xff]  }
  0x3c   :  { %v539_v17 = vld [vmem:[#allocation5 + $0x78] sm:$0xff]   ;;  %v541_v19 = vld [vmem:[#allocation5 + $0x88] sm:$0xff]   ;;  %v542_v20 = vld [vmem:[#allocation5 + $0x90] sm:$0xff]   ;;  %p621_p13 = por %p620_p12, %p619_p11 }
  0x3d   :  { %459 = vmatpush3.bf16.msra.mxu0 %v525_v2  ;;  %479 = vmatpush3.bf16.msra.mxu1 %v533_v6  ;;  %v543_v21 = vld [vmem:[#allocation5 + $0x98] sm:$0xff]   ;;  %v544_v22 = vld [vmem:[#allocation5 + $0xa0] sm:$0xff]   ;;  %v545_v23 = vld [vmem:[#allocation5 + $0xa8] sm:$0xff]  }
  0x3e   :  { %460 = vmatprep.subr.bf16.mxu0 %v647_v0  ;;  %480 = vmatprep.subr.bf16.mxu1 %v647_v0  ;;  %v402_v24 = vld [vmem:[#allocation7] ss:$0 sm:$0xff]  ;;  %v546_v32 = vld [vmem:[#allocation5 + $0xb0] sm:$0xff]   ;;  %v547_v33 = vld [vmem:[#allocation5 + $0xb8] sm:$0xff]   ;;  %p622_p0 = pnand %p621_p13, %p615_p10 }
  0x3f   :  { %v411_v34 = vld [vmem:[#allocation7 + $0x1] ss:$0 sm:$0xff]  ;;  %v420_v42 = vld [vmem:[#allocation7 + $0x2] ss:$0 sm:$0xff] }
  0x41   :  { %461 = vmatpush3.bf16.msra.mxu0 %v526_v3  ;;  %481 = vmatpush3.bf16.msra.mxu1 %v534_v8 }
  0x42   :  { %462 = vmatprep.subr.bf16.mxu0 %v647_v0  ;;  %482 = vmatprep.subr.bf16.mxu1 %v647_v0 }
  0x45   :  { %463 = vmatpush3.bf16.msra.mxu0 %v527_v5  ;;  %483 = vmatpush3.bf16.msra.mxu1 %v535_v10 }
  0x46   :  { %464 = vmatprep.subr.bf16.mxu0 %v647_v0  ;;  %484 = vmatprep.subr.bf16.mxu1 %v647_v0 }
  0x49   :  { %465 = vmatpush3.bf16.msra.mxu0 %v528_v7  ;;  %485 = vmatpush3.bf16.msra.mxu1 %v536_v12 }
  0x4a   :  { %466 = vmatprep.subr.bf16.mxu0 %v647_v0  ;;  %486 = vmatprep.subr.bf16.mxu1 %v647_v0 }
  0x4d   :  { %467 = vmatpush3.bf16.msra.mxu0 %v529_v9  ;;  %487 = vmatpush3.bf16.msra.mxu1 %v537_v14 }
  0x4e   :  { %468 = vmatprep.subr.bf16.mxu0 %v647_v0  ;;  %488 = vmatprep.subr.bf16.mxu1 %v647_v0 }
  0x51   :  { %469 = vmatpush3.bf16.msra.mxu0 %v530_v11  ;;  %489 = vmatpush3.bf16.msra.mxu1 %v538_v16 }
  0x52   :  { %470 = vmatprep.subr.bf16.mxu0 %v647_v0  ;;  %490 = vmatprep.subr.bf16.mxu1 %v647_v0 }
  0x55   :  { %471 = vmatpush3.bf16.msra.mxu0 %v531_v13  ;;  %491 = vmatpush3.bf16.msra.mxu1 %v539_v17 }
  0x56   :  { %496 = vmatprep.subr.bf16.mxu0 %v647_v0 }
  0x58   :  { %473 = vmatmul.mubr.bf16.vlgmr.msra.gmra.mrb[0].mxu0 %v53_v15 }
  0x59   :  { %512 = vmatprep.mubr.msk.bf16.mxu0 %vm648_vm0, %v647_v0  ;;  %497 = vmatpush3.bf16.msra.mxu0 %v540_v18 }
  0x5a   :  { %498 = vmatprep.subr.bf16.mxu0 %v647_v0 }
  0x5d   :  { %499 = vmatpush3.bf16.msra.mxu0 %v541_v19 }
  0x5e   :  { %500 = vmatprep.subr.bf16.mxu0 %v647_v0 }
  0x61   :  { %501 = vmatpush3.bf16.msra.mxu0 %v542_v20 }
  0x62   :  { %502 = vmatprep.subr.bf16.mxu0 %v647_v0 }
  0x65   :  { %503 = vmatpush3.bf16.msra.mxu0 %v543_v21 }
  0x66   :  { %504 = vmatprep.subr.bf16.mxu0 %v647_v0 }
  0x69   :  { %505 = vmatpush3.bf16.msra.mxu0 %v544_v22 }
  0x6a   :  { %506 = vmatprep.subr.bf16.mxu0 %v647_v0 }
  0x6d   :  { %507 = vmatpush3.bf16.msra.mxu0 %v545_v23 }
  0x6e   :  { %508 = vmatprep.subr.bf16.mxu0 %v647_v0 }
  0x71   :  { %509 = vmatpush3.bf16.msra.mxu0 %v546_v32 }
  0x72   :  { %510 = vmatprep.subr.bf16.mxu0 %v647_v0 }
  0x75   :  { %511 = vmatpush3.bf16.msra.mxu0 %v547_v33 }
 0x12b   :  { %v157_v25 = vpop.f32.mrb[0].mxu0 }
 0x12c   :  { %v158_v26 = vadd.f32 %v402_v24, %v157_v25  ;;  %v474_v27 = vpop.f32.mrb[1].mxu0 }
 0x12d   :  { %v160_v28 = vpop.f32.mrb[2].mxu0 }
 0x12e   :  { %v163_v29 = vmax.f32 %v158_v26, 0.0  ;;  %v475_v30 = vpop.f32.mrb[3].mxu0 }
 0x130   :  { %v164_v31 = vpack.c.bf16 %v163_v29, %v163_v29 }
 0x132   :  { %493 = vmatmul.mubr.bf16.vlgmr.msra.gmra.mrb[0].mxu1 %v164_v31 }
 0x205   :  { %v268_v35 = vpop.f32.mrb[0].mxu1 }
 0x206   :  { %v269_v36 = vadd.f32 %v411_v34, %v268_v35  ;;  %v494_v37 = vpop.f32.mrb[1].mxu1 }
 0x207   :  { %v271_v38 = vpop.f32.mrb[2].mxu1 }
 0x208   :  { %v274_v39 = vmax.f32 %v269_v36, 0.0  ;;  %v495_v40 = vpop.f32.mrb[3].mxu1 }
 0x20a   :  { %v275_v41 = vpack.c.bf16 %v274_v39, %v274_v39 }
 0x20c   :  { %513 = vmatmul.mubr.bf16.vlgmr.msra.gmra.mrb[4].mxu0 %v275_v41 }
 0x2df   :  { %v379_v43 = vpop.f32.mrb[4].mxu0 }
 0x2e0   :  { %v380_v44 = vadd.f32 %v420_v42, %v379_v43  ;;  %v514_v45 = vpop.f32.mrb[5].mxu0 }
 0x2e1   :  { %v382_v46 = vpop.f32.mrb[6].mxu0 }
 0x2e2   :  { %385 = vst [vmem:[#allocation8] sm:$0xff] %v380_v44  ;;  %v515_v47 = vpop.f32.mrb[7].mxu0 }
 0x2e3   :  { %625 = shalt.err (!%p622_p0)
}
 0x2e4   :  { %s626_s25 = scalar_lea.hbm %s751_s3, 128 }
 0x2e5   :  { %p627_p1 = scmp.ne.s32.totalorder %s751_s3, %s626_s25  ;;  %p630_p2 = scmp.lt.u32.totalorder %s626_s25, %s751_s3 }
 0x2e7   :  { %p632_p3 = pnand %p630_p2, %p627_p1 }
 0x2e9   :  { %635 = shalt.err (!%p632_p3)
}
 0x2ea   :  { %395 = dma.vmem_to_hbm [thread:$0]  %s393_s21, 128, %s751_s3, [#allocation4]  }
 0x2eb   :  { %640 = dma.done.wait [#allocation4], 128  }
 0x2ec   :  { %641 = vsyncadd [#allocation4], 4294967168 }
 0x2ed   :  { %399 = vsyncpa [#allocation3], 1 }
 0x2ee   :  { %400 = vsyncpa [#allocation6], 1 }
 0x2ef   :  { %401 = vsyncpa [#allocation4], 1 }

</bundles_post_ra>
